<compile_context>
chip_gen: v7x
topology: tpu7x:2x2x1
jax: 0.10.0
libtpu: 0.0.40
codegen_flags: <defaults>
</compile_context>

<pallas_src>
import functools

import jax
import jax.numpy as jnp
from jax.experimental import pallas as pl
from jax.experimental.pallas import tpu as pltpu

LANES = 128
SUBLANES = 8
BLOCK_BYTES = 4 * 1024 * 1024       # target bytes per input block (per buffer)
VMEM_LIMIT_BYTES = 32 * 1024 * 1024  # 2 inputs x 2 buffers x 4 MiB = 16 MiB + slack


def _round_up(x, m):
    return ((x + m - 1) // m) * m


def _num_tensorcores():
    # Split the leading grid axis only on multi-TensorCore chips (v7x).
    try:
        kind = jax.devices()[0].device_kind.lower()
    except Exception:
        return 1
    return 2 if ("v7" in kind or "7x" in kind) else 1


def _tversky_partials_kernel(x_ref, t_ref, o_ref, *, bpc, last_block, row0_last,
                             rows_total, masked):
    c = pl.program_id(0)   # core split ("parallel")
    i = pl.program_id(1)   # row-tile index within this core's range ("arbitrary")

    @pl.when(i == 0)
    def _():
        o_ref[...] = jnp.zeros_like(o_ref)

    # Stream in native dtype; cast to f32 on the VPU (hidden under the DMA).
    x = x_ref[...].astype(jnp.float32)   # (TM, 128)
    t = t_ref[...].astype(jnp.float32)

    def accumulate(xv, tv):
        # Single pass: reshape once to (TM/8, 8, 128) vreg groups and do pure
        # VPU adds -> (8,128) partials; no cross-lane XLU work in the hot loop.
        xr = xv.reshape(-1, SUBLANES, LANES)
        tr = tv.reshape(-1, SUBLANES, LANES)
        o_ref[0, 0] += jnp.sum(xr * tr, axis=0)   # partial sum(x * t)
        o_ref[0, 1] += jnp.sum(xr, axis=0)        # partial sum(x)
        o_ref[0, 2] += jnp.sum(tr, axis=0)        # partial sum(t)

    if not masked:
        # All tiles fully valid: unmasked fast path everywhere.
        accumulate(x, t)
    else:
        gb = c * bpc + i   # global (unclamped) block index

        @pl.when(gb < last_block)
        def _():           # interior tiles: unmasked fast path
            accumulate(x, t)

        @pl.when(gb == last_block)
        def _():           # tail tile: mask rows past the array bound
            rid = row0_last + jax.lax.broadcasted_iota(jnp.int32, x.shape, 0)
            valid = rid < rows_total
            accumulate(jnp.where(valid, x, 0.0), jnp.where(valid, t, 0.0))
        # gb > last_block: clamped duplicate tile (v7x core imbalance) -> no-op.


def tversky_loss(inputs, targets, alpha=0.5, beta=0.5, smooth=1.0):
    """Pallas TPU implementation of TverskyLoss.forward (scalar output)."""
    x = jnp.ravel(inputs)
    t = jnp.ravel(targets)
    n = x.shape[0]

    # Reshape (free bitcast) to (rows, 128) lanes-dense layout.
    n128 = _round_up(n, LANES)
    if n128 != n:
        # TODO(synk): replace this full-copy pad with an in-kernel lane-tail mask
        # (only hit when n % 128 != 0; extra HBM read+write pass in that case).
        x = jnp.pad(x, (0, n128 - n))
        t = jnp.pad(t, (0, n128 - n))
    rows = n128 // LANES
    x2 = x.reshape(rows, LANES)
    t2 = t.reshape(rows, LANES)

    # Dtype-aware tile rows: sublane multiple 8/16/32 for 4/2/1-byte dtypes,
    # tile sized to ~4 MiB per input block for the widest streamed dtype.
    itemsizes = (jnp.dtype(x2.dtype).itemsize, jnp.dtype(t2.dtype).itemsize)
    sub_mult = {4: 8, 2: 16, 1: 32}.get(min(itemsizes), 8)
    tm_max = (BLOCK_BYTES // (LANES * max(itemsizes))) // sub_mult * sub_mult
    tm_max = max(tm_max, sub_mult)
    tm = min(tm_max, _round_up(rows, sub_mult))

    blocks_total = pl.cdiv(rows, tm)
    nc = min(_num_tensorcores(), blocks_total)     # 1 on v5e/v6e, 2 on v7x
    bpc = pl.cdiv(blocks_total, nc)                # row-tiles per core
    last_block = blocks_total - 1
    masked = (blocks_total * tm != rows) or (nc * bpc != blocks_total)

    def in_map(c, i):
        # Clamp so the DMA window always starts inside the array; clamped
        # (duplicate) tiles contribute nothing inside the kernel.
        return (jnp.minimum(c * bpc + i, last_block), 0)

    kernel = functools.partial(
        _tversky_partials_kernel,
        bpc=bpc, last_block=last_block, row0_last=last_block * tm,
        rows_total=rows, masked=masked,
    )

    partials = pl.pallas_call(
        kernel,
        out_shape=jax.ShapeDtypeStruct((nc, 3, SUBLANES, LANES), jnp.float32),
        grid=(nc, bpc),
        in_specs=[
            pl.BlockSpec((tm, LANES), in_map),
            pl.BlockSpec((tm, LANES), in_map),
        ],
        out_specs=pl.BlockSpec((1, 3, SUBLANES, LANES), lambda c, i: (c, 0, 0, 0)),
        compiler_params=pltpu.CompilerParams(
            # TODO(synk): on v7x verify via xprof that the leading "parallel" axis
            # actually engages both TensorCores; switch to CORE_PARALLEL/core_map
            # if one core does all the work.
            dimension_semantics=("parallel", "arbitrary"),
            vmem_limit_bytes=VMEM_LIMIT_BYTES,
        ),
    )(x2, t2)

    # Tiny final cross-lane reduce + Tversky formula (done once, outside the kernel).
    sums = jnp.sum(partials, axis=(0, 2, 3))       # [sum(x*t), sum(x), sum(t)]
    tp, sx, st = sums[0], sums[1], sums[2]
    fp = sx - tp                                   # == sum((1 - t) * x)
    fn = st - tp                                   # == sum(t * (1 - x))
    tversky = (tp + smooth) / (tp + alpha * fp + beta * fn + smooth)
    return 1.0 - tversky


def _reference(inputs, targets, alpha=0.5, beta=0.5, smooth=1.0):
    x = jnp.ravel(inputs).astype(jnp.float32)
    t = jnp.ravel(targets).astype(jnp.float32)
    TP = jnp.sum(x * t)
    FP = jnp.sum((1.0 - t) * x)
    FN = jnp.sum(t * (1.0 - x))
    tversky = (TP + smooth) / (TP + alpha * FP + beta * FN + smooth)
    return 1.0 - tversky


if __name__ == "__main__":
    key = jax.random.PRNGKey(0)
    k1, k2 = jax.random.split(key)
    # NCHW-like input (batch=2, channels=4, spatial=16x16), as in a UNet output.
    inputs = jax.nn.sigmoid(jax.random.normal(k1, (2, 4, 16, 16), dtype=jnp.float32))
    targets = (jax.random.uniform(k2, (2, 4, 16, 16)) > 0.5).astype(jnp.float32)

    loss = jax.block_until_ready(tversky_loss(inputs, targets))
    ref = _reference(inputs, targets)

    assert jnp.allclose(loss, ref, rtol=1e-5, atol=1e-5), (loss, ref)
    print("KERNEL_OK")
</pallas_src>

<mosaic_0001>
module attributes {stable_mosaic.version = 11 : i64} {
  func.func @_tversky_partials_kernel(%arg0: i32, %arg1: i32, %arg2: memref<16x128xf32, #tpu.memory_space<vmem>>, %arg3: memref<16x128xf32, #tpu.memory_space<vmem>>, %arg4: memref<1x3x8x128xf32, #tpu.memory_space<vmem>>) attributes {dimension_semantics = [#tpu.dimension_semantics<parallel>, #tpu.dimension_semantics<arbitrary>], iteration_bounds = array<i64: 1, 1>, scalar_prefetch = 0 : i64, scratch_operands = 0 : i64, tpu.core_type = #tpu.core_type<tc>, window_params = [{transform_indices = @transform_0, window_bounds = array<i64: 16, 128>}, {transform_indices = @transform_1, window_bounds = array<i64: 16, 128>}, {transform_indices = @transform_2, window_bounds = array<i64: 1, 3, 8, 128>}]} {
    %c0_i32 = arith.constant 0 : i32
    %0 = arith.cmpi eq, %arg1, %c0_i32 : i32
    %1 = arith.extui %0 : i1 to i32
    %c0_i32_0 = arith.constant 0 : i32
    %2 = arith.cmpi ne, %1, %c0_i32_0 : i32
    scf.if %2 {
      %cst_28 = arith.constant 0.000000e+00 : f32
      %29 = vector.broadcast %cst_28 : f32 to vector<1x3x8x128xf32>
      %c0_29 = arith.constant 0 : index
      %c0_30 = arith.constant 0 : index
      %c0_31 = arith.constant 0 : index
      %c0_32 = arith.constant 0 : index
      %30 = vector.load %arg4[%c0_29, %c0_30, %c0_31, %c0_32] : memref<1x3x8x128xf32, #tpu.memory_space<vmem>>, vector<1x3x8x128xf32>
      tpu.vector_store %arg4[%c0_29, %c0_30, %c0_31, %c0_32], %29 {strides = array<i32>} : memref<1x3x8x128xf32, #tpu.memory_space<vmem>>, vector<1x3x8x128xf32>,
    } else {
    }
    %c0 = arith.constant 0 : index
    %c0_1 = arith.constant 0 : index
    %3 = vector.load %arg2[%c0, %c0_1] : memref<16x128xf32, #tpu.memory_space<vmem>>, vector<16x128xf32>
    %c0_2 = arith.constant 0 : index
    %c0_3 = arith.constant 0 : index
    %4 = vector.load %arg3[%c0_2, %c0_3] : memref<16x128xf32, #tpu.memory_space<vmem>>, vector<16x128xf32>
    %5 = vector.shape_cast %3 : vector<16x128xf32> to vector<2x8x128xf32>
    %6 = vector.shape_cast %4 : vector<16x128xf32> to vector<2x8x128xf32>
    %c0_4 = arith.constant 0 : index
    %c0_5 = arith.constant 0 : index
    %c0_6 = arith.constant 0 : index
    %c0_7 = arith.constant 0 : index
    %7 = vector.load %arg4[%c0_4, %c0_5, %c0_6, %c0_7] : memref<1x3x8x128xf32, #tpu.memory_space<vmem>>, vector<1x1x8x128xf32>
    %8 = vector.shape_cast %7 : vector<1x1x8x128xf32> to vector<8x128xf32>
    %9 = arith.mulf %5, %6 : vector<2x8x128xf32>
    %cst = arith.constant dense<0.000000e+00> : vector<8x128xf32>
    %10 = vector.multi_reduction <add>, %9, %cst [0] : vector<2x8x128xf32> to vector<8x128xf32>
    %11 = arith.addf %8, %10 : vector<8x128xf32>
    %c0_8 = arith.constant 0 : index
    %c0_9 = arith.constant 0 : index
    %c0_10 = arith.constant 0 : index
    %c0_11 = arith.constant 0 : index
    %12 = vector.load %arg4[%c0_8, %c0_9, %c0_10, %c0_11] : memref<1x3x8x128xf32, #tpu.memory_space<vmem>>, vector<1x1x8x128xf32>
    %13 = vector.shape_cast %12 : vector<1x1x8x128xf32> to vector<8x128xf32>
    %14 = vector.shape_cast %11 : vector<8x128xf32> to vector<1x1x8x128xf32>
    tpu.vector_store %arg4[%c0_8, %c0_9, %c0_10, %c0_11], %14 {strides = array<i32>} : memref<1x3x8x128xf32, #tpu.memory_space<vmem>>, vector<1x1x8x128xf32>,
    %c0_12 = arith.constant 0 : index
    %c1 = arith.constant 1 : index
    %c0_13 = arith.constant 0 : index
    %c0_14 = arith.constant 0 : index
    %15 = vector.load %arg4[%c0_12, %c1, %c0_13, %c0_14] : memref<1x3x8x128xf32, #tpu.memory_space<vmem>>, vector<1x1x8x128xf32>
    %16 = vector.shape_cast %15 : vector<1x1x8x128xf32> to vector<8x128xf32>
    %cst_15 = arith.constant dense<0.000000e+00> : vector<8x128xf32>
    %17 = vector.multi_reduction <add>, %5, %cst_15 [0] : vector<2x8x128xf32> to vector<8x128xf32>
    %18 = arith.addf %16, %17 : vector<8x128xf32>
    %c0_16 = arith.constant 0 : index
    %c1_17 = arith.constant 1 : index
    %c0_18 = arith.constant 0 : index
    %c0_19 = arith.constant 0 : index
    %19 = vector.load %arg4[%c0_16, %c1_17, %c0_18, %c0_19] : memref<1x3x8x128xf32, #tpu.memory_space<vmem>>, vector<1x1x8x128xf32>
    %20 = vector.shape_cast %19 : vector<1x1x8x128xf32> to vector<8x128xf32>
    %21 = vector.shape_cast %18 : vector<8x128xf32> to vector<1x1x8x128xf32>
    tpu.vector_store %arg4[%c0_16, %c1_17, %c0_18, %c0_19], %21 {strides = array<i32>} : memref<1x3x8x128xf32, #tpu.memory_space<vmem>>, vector<1x1x8x128xf32>,
    %c0_20 = arith.constant 0 : index
    %c2 = arith.constant 2 : index
    %c0_21 = arith.constant 0 : index
    %c0_22 = arith.constant 0 : index
    %22 = vector.load %arg4[%c0_20, %c2, %c0_21, %c0_22] : memref<1x3x8x128xf32, #tpu.memory_space<vmem>>, vector<1x1x8x128xf32>
    %23 = vector.shape_cast %22 : vector<1x1x8x128xf32> to vector<8x128xf32>
    %cst_23 = arith.constant dense<0.000000e+00> : vector<8x128xf32>
    %24 = vector.multi_reduction <add>, %6, %cst_23 [0] : vector<2x8x128xf32> to vector<8x128xf32>
    %25 = arith.addf %23, %24 : vector<8x128xf32>
    %c0_24 = arith.constant 0 : index
    %c2_25 = arith.constant 2 : index
    %c0_26 = arith.constant 0 : index
    %c0_27 = arith.constant 0 : index
    %26 = vector.load %arg4[%c0_24, %c2_25, %c0_26, %c0_27] : memref<1x3x8x128xf32, #tpu.memory_space<vmem>>, vector<1x1x8x128xf32>
    %27 = vector.shape_cast %26 : vector<1x1x8x128xf32> to vector<8x128xf32>
    %28 = vector.shape_cast %25 : vector<8x128xf32> to vector<1x1x8x128xf32>
    tpu.vector_store %arg4[%c0_24, %c2_25, %c0_26, %c0_27], %28 {strides = array<i32>} : memref<1x3x8x128xf32, #tpu.memory_space<vmem>>, vector<1x1x8x128xf32>,
    return
  }
  func.func @transform_0(%arg0: i32, %arg1: i32) -> (i32, i32) {
    %c1_i32 = arith.constant 1 : i32
    %0 = arith.muli %arg0, %c1_i32 : i32
    %1 = arith.addi %0, %arg1 : i32
    %c0_i32 = arith.constant 0 : i32
    %2 = arith.minsi %1, %c0_i32 : i32
    %c0_i32_0 = arith.constant 0 : i32
    %c0_i32_1 = arith.constant 0 : i32
    return %2, %c0_i32_0 : i32, i32
  }
  func.func @transform_1(%arg0: i32, %arg1: i32) -> (i32, i32) {
    %c1_i32 = arith.constant 1 : i32
    %0 = arith.muli %arg0, %c1_i32 : i32
    %1 = arith.addi %0, %arg1 : i32
    %c0_i32 = arith.constant 0 : i32
    %2 = arith.minsi %1, %c0_i32 : i32
    %c0_i32_0 = arith.constant 0 : i32
    %c0_i32_1 = arith.constant 0 : i32
    return %2, %c0_i32_0 : i32, i32
  }
  func.func @transform_2(%arg0: i32, %arg1: i32) -> (i32, i32, i32, i32) {
    %c0_i32 = arith.constant 0 : i32
    %c0_i32_0 = arith.constant 0 : i32
    %c0_i32_1 = arith.constant 0 : i32
    %c0_i32_2 = arith.constant 0 : i32
    return %arg0, %c0_i32, %c0_i32_0, %c0_i32_1 : i32, i32, i32, i32
  }
}

</mosaic_0001>

<bundles_post_ra>
// kernel: tpu_custom_call.1
= control target key start
LH: loop header
LB: loop body
LE: loop exit
PB: predicated region body
PF: predicated region fallthrough
CT: control target
= control target key end

     0   :  { %7 = vsyncpa [#allocation3], 0  ;;  %s252_s0 = inlined_call_operand.hbm [shape: f32[16,128], index: 0, kind: input, shape index: {}]   ;;  %s253_s1 = inlined_call_operand.hbm [shape: f32[16,128], index: 1, kind: input, shape index: {}]   ;;  %s254_s2 = inlined_call_operand.hbm [shape: f32[1,3,8,128], index: 2, kind: output, shape index: {}]  }
   0x1   :  { %8 = vsyncpa [#allocation6], 0 }
   0x2   :  { %9 = vsyncpa [#allocation4], 0  ;;  %s187_s9 = smov [#allocation2]   ;;  %s115_s13 = scalar_lea.hbm %s252_s0, 256 }
   0x3   :  { %s21_s10 = sshll.u32 %s187_s9, 4  ;;  %p116_p0 = scmp.ne.s32.totalorder %s252_s0, %s115_s13  ;;  %s22_s10 = int_to_ptr.vmem [resolvable:$true] %s21_s10 }
   0x4   :  { %p119_p1 = scmp.lt.u32.totalorder %s115_s13, %s252_s0 }
   0x6   :  { %p121_p2 = pnand %p119_p1, %p116_p0 }
   0x8   :  { %124 = shalt.err (!%p121_p2)
}
   0x9   :  { %s125_s18 = scalar_lea.vmem %s22_s10, 256  ;;  %p130_p4 = scmp.lt.s32.totalorder %s22_s10, %s22_s10 }
   0xa   :  { %p126_p3 = scmp.ne.s32.totalorder %s22_s10, %s125_s18  ;;  %p131_p5 = scmp.lt.s32.totalorder %s125_s18, %s125_s18 }
   0xc   :  { %p132_p6 = por %p131_p5, %p130_p4 }
   0xe   :  { %p133_p7 = pnand %p132_p6, %p126_p3 }
  0x10   :  { %136 = shalt.err (!%p133_p7)
}
  0x11   :  { %s188_s19 = smov 128   ;;  %s189_s20 = smov 8  }
  0x12   :  { %27 = dma.hbm_to_vmem [thread:$0]  %s252_s0, 256, %s22_s10, [#allocation3], %s188_s19, %s188_s19, %s189_s20  }
  0x13   :  { %s190_s23 = smov [#allocation5]   ;;  %s137_s27 = scalar_lea.hbm %s253_s1, 256 }
  0x14   :  { %s39_s24 = sshll.u32 %s190_s23, 4  ;;  %p138_p8 = scmp.ne.s32.totalorder %s253_s1, %s137_s27  ;;  %s40_s24 = int_to_ptr.vmem [resolvable:$true] %s39_s24 }
  0x15   :  { %p141_p9 = scmp.lt.u32.totalorder %s137_s27, %s253_s1 }
  0x17   :  { %p143_p10 = pnand %p141_p9, %p138_p8 }
  0x19   :  { %146 = shalt.err (!%p143_p10)
}
  0x1a   :  { %s147_s4 = scalar_lea.vmem %s40_s24, 256  ;;  %p152_p12 = scmp.lt.s32.totalorder %s40_s24, %s40_s24 }
  0x1b   :  { %p148_p11 = scmp.ne.s32.totalorder %s40_s24, %s147_s4  ;;  %p153_p13 = scmp.lt.s32.totalorder %s147_s4, %s147_s4 }
  0x1d   :  { %p154_p0 = por %p153_p13, %p152_p12 }
  0x1f   :  { %p155_p1 = pnand %p154_p0, %p148_p11 }
  0x21   :  { %158 = shalt.err (!%p155_p1)
}
  0x22   :  { %45 = dma.hbm_to_vmem [thread:$0]  %s253_s1, 256, %s40_s24, [#allocation6], %s188_s19, %s188_s19, %s189_s20  }
  0x23   :  { %181 = dma.done.wait [#allocation3], 256  }
  0x24   :  { %182 = vsyncadd [#allocation3], 4294967040 }
  0x25   :  { %183 = dma.done.wait [#allocation6], 256  }
  0x26   :  { %184 = vsyncadd [#allocation6], 4294967040  ;;  %v67_v0 = vld [vmem:[#allocation2] sm:$0xff]  ;;  %v68_v1 = vld [vmem:[#allocation2 + $0x8] sm:$0xff]  ;;  %s191_s6 = smov [#allocation7]  }
  0x27   :  { %v69_v2 = vld [vmem:[#allocation5] sm:$0xff]  ;;  %v70_v3 = vld [vmem:[#allocation5 + $0x8] sm:$0xff]  ;;  %v79_v5 = vadd.f32 %v68_v1, %v67_v0  ;;  %s92_s7 = sshll.u32 %s191_s6, 4  ;;  %s93_s7 = int_to_ptr.vmem [resolvable:$true] %s92_s7 }
  0x28   :  { %v72_v4 = vmul.f32 %v69_v2, %v67_v0  ;;  %v73_v6 = vmul.f32 %v70_v3, %v68_v1  ;;  %v84_v7 = vadd.f32 %v70_v3, %v69_v2  ;;  %s159_s1 = scalar_lea.vmem %s93_s7, 384  ;;  %p164_p3 = scmp.lt.s32.totalorder %s93_s7, %s93_s7 }
  0x29   :  { %81 = vst [vmem:[#allocation7 + $0x8] sm:$0xff] %v79_v5  ;;  %p160_p2 = scmp.ne.s32.totalorder %s93_s7, %s159_s1  ;;  %p165_p4 = scmp.lt.s32.totalorder %s159_s1, %s159_s1 }
  0x2a   :  { %v74_v8 = vadd.f32 %v73_v6, %v72_v4  ;;  %86 = vst [vmem:[#allocation7 + $0x10] sm:$0xff] %v84_v7 }
  0x2b   :  { %p166_p5 = por %p165_p4, %p164_p3 }
  0x2c   :  { %76 = vst [vmem:[#allocation7] sm:$0xff] %v74_v8 }
  0x2d   :  { %p167_p6 = pnand %p166_p5, %p160_p2 }
  0x2f   :  { %170 = shalt.err (!%p167_p6)
}
  0x30   :  { %s171_s10 = scalar_lea.hbm %s254_s2, 384 }
  0x31   :  { %p172_p7 = scmp.ne.s32.totalorder %s254_s2, %s171_s10  ;;  %p175_p8 = scmp.lt.u32.totalorder %s171_s10, %s254_s2 }
  0x33   :  { %p177_p9 = pnand %p175_p8, %p172_p7 }
  0x35   :  { %180 = shalt.err (!%p177_p9)
}
  0x36   :  { %98 = dma.vmem_to_hbm [thread:$0]  %s93_s7, 384, %s254_s2, [#allocation4], %s188_s19, %s188_s19, %s189_s20  }
  0x37   :  { %185 = dma.done.wait [#allocation4], 384  }
  0x38   :  { %186 = vsyncadd [#allocation4], 4294966912 }
  0x39   :  { %102 = vsyncpa [#allocation3], 1 }
  0x3a   :  { %103 = vsyncpa [#allocation6], 1 }
  0x3b   :  { %104 = vsyncpa [#allocation4], 1 }

</bundles_post_ra>
